<compile_context>
chip_gen: v7x
topology: tpu7x:2x2x1
jax: 0.10.0
libtpu: 0.0.40
codegen_flags: <defaults>
</compile_context>

<pallas_src>
import functools
import math

import jax
import jax.numpy as jnp
from jax.experimental import pallas as pl
from jax.experimental.pallas import tpu as pltpu

_HALF_LOG_2PI = 0.5 * math.log(2.0 * math.pi)


def policy_kernel(x_ref, w1t_ref, b1_ref, wht_ref, bh_ref, eps_ref, out_ref, *,
                  action_dim, action_bound):
    # Batch-on-lanes layout: every operand/result is [feature, TILE_B] with
    # TILE_B (a multiple of 128) on the lane axis.
    x_t = x_ref[...]                                                  # [S, TILE_B]

    # fc1 + ReLU:  [H, S] @ [S, TILE_B] -> [H, TILE_B]
    h = jnp.dot(w1t_ref[...], x_t, preferred_element_type=jnp.float32) + b1_ref[...]
    h = jnp.maximum(h, 0.0)

    # Fused head (mu | std pre-activation): [2A, H] @ [H, TILE_B] -> [2A, TILE_B]
    head = jnp.dot(wht_ref[...], h, preferred_element_type=jnp.float32) + bh_ref[...]
    mu = head[:action_dim, :]        # sublane-tile-boundary slices: free
    z = head[action_dim:, :]

    # softplus (stable form): max(z,0) + log1p(exp(-|z|))
    std = jnp.maximum(z, 0.0) + jnp.log1p(jnp.exp(-jnp.abs(z)))

    # Normal(mu, std).rsample() via reparameterization.
    eps = eps_ref[...]
    normal_sample = mu + std * eps

    # tanh squash; the PyTorch reference subtracts log(1 - tanh(action)^2 + 1e-7)
    # where `action` is ALREADY tanh(normal_sample) -> tanh applied twice.
    # TODO(synk): standard SAC uses tanh(normal_sample)^2 here; keeping the
    # reference's double-tanh quirk for faithful semantics.
    action = jnp.tanh(normal_sample)
    t2 = jnp.tanh(action)

    # Normal log_prob(normal_sample): (normal_sample - mu)/std == eps exactly,
    # so skip the subtract + divide.  Fuse the two logs into one EUP push:
    # log(std) + log(1 - t2^2 + 1e-7) == log(std * (1 - t2^2 + 1e-7)).
    log_prob = (-0.5 * eps * eps - _HALF_LOG_2PI
                - jnp.log(std * (1.0 - t2 * t2 + 1e-7)))

    # Direct slice stores at sublane-tile boundaries (no concat temp).
    out_ref[:action_dim, :] = action * action_bound
    out_ref[action_dim:, :] = log_prob


def _round_up(n, m):
    return ((n + m - 1) // m) * m


def _select_tiling(batch, tile_b):
    """Pick a lane-axis batch tile (multiple of 128) and the padded batch size."""
    b128 = _round_up(max(batch, 1), 128)
    if b128 <= 128:
        tile = 128
    elif b128 <= 2 * tile_b:
        # Split into two balanced tiles so a v7x chip uses both TensorCores.
        tile = _round_up(b128 // 2, 128)
    else:
        tile = tile_b
    b_pad = _round_up(b128, tile)
    return tile, b_pad


def policy_forward(x, params, eps, action_bound, *, tile_b=1024):
    """x: [B, state_dim] f32; eps: [B, action_dim] f32 standard-normal noise."""
    w1, b1, wmu, bmu, wstd, bstd = params
    B, S = x.shape
    H = w1.shape[1]
    A = wmu.shape[1]

    # Pre-transpose parameters once (batch-on-lanes layout), fusing mu/std.
    w1t = w1.T                                              # [H, S]
    b1t = b1.reshape(H, 1)                                  # [H, 1]
    wht = jnp.concatenate([wmu, wstd], axis=1).T            # [2A, H]
    bht = jnp.concatenate([bmu, bstd], axis=1).reshape(2 * A, 1)

    TILE_B, B_pad = _select_tiling(B, tile_b)

    # Transpose activations to [feature, batch] and pad the (lane) batch axis.
    x_t = jnp.pad(x.T, ((0, 0), (0, B_pad - B)))            # [S, B_pad]
    eps_t = jnp.pad(eps.T, ((0, 0), (0, B_pad - B)))        # [A, B_pad]

    grid = (B_pad // TILE_B,)

    kernel = functools.partial(policy_kernel, action_dim=A,
                               action_bound=float(action_bound))

    out = pl.pallas_call(
        kernel,
        out_shape=jax.ShapeDtypeStruct((2 * A, B_pad), jnp.float32),
        grid=grid,
        in_specs=[
            pl.BlockSpec((S, TILE_B), lambda i: (0, i)),     # x^T (tiled over batch)
            pl.BlockSpec((H, S), lambda i: (0, 0)),          # W1^T (VMEM-resident)
            pl.BlockSpec((H, 1), lambda i: (0, 0)),          # b1
            pl.BlockSpec((2 * A, H), lambda i: (0, 0)),      # fused head weight^T
            pl.BlockSpec((2 * A, 1), lambda i: (0, 0)),      # fused head bias
            pl.BlockSpec((A, TILE_B), lambda i: (0, i)),     # eps^T (tiled over batch)
        ],
        out_specs=pl.BlockSpec((2 * A, TILE_B), lambda i: (0, i)),
        compiler_params=pltpu.CompilerParams(
            dimension_semantics=("parallel",)),
    )(x_t, w1t, b1t, wht, bht, eps_t)

    action = out[:A, :B].T
    log_prob = out[A:, :B].T
    return action, log_prob


def init_params(key, state_dim, hidden_dim, action_dim):
    """Deterministic init mimicking nn.Linear's uniform(-1/sqrt(fan_in), +...)."""
    ks = jax.random.split(key, 6)

    def lin(kw, kb, fan_in, fan_out):
        bound = 1.0 / math.sqrt(fan_in)
        w = jax.random.uniform(kw, (fan_in, fan_out), jnp.float32, -bound, bound)
        b = jax.random.uniform(kb, (1, fan_out), jnp.float32, -bound, bound)
        return w, b

    w1, b1 = lin(ks[0], ks[1], state_dim, hidden_dim)
    wmu, bmu = lin(ks[2], ks[3], hidden_dim, action_dim)
    wstd, bstd = lin(ks[4], ks[5], hidden_dim, action_dim)
    return (w1, b1, wmu, bmu, wstd, bstd)


if __name__ == "__main__":
    state_dim, hidden_dim, action_dim = 16, 32, 8
    batch = 2
    action_bound = 2.0

    key = jax.random.PRNGKey(0)
    k_param, k_x, k_eps = jax.random.split(key, 3)

    params = init_params(k_param, state_dim, hidden_dim, action_dim)
    x = jax.random.normal(k_x, (batch, state_dim), dtype=jnp.float32)
    eps = jax.random.normal(k_eps, (batch, action_dim), dtype=jnp.float32)

    action, log_prob = policy_forward(x, params, eps, action_bound)
    jax.block_until_ready((action, log_prob))

    # Pure-JAX reference check (same math as the PyTorch module, outside Pallas).
    w1, b1, wmu, bmu, wstd, bstd = params
    h = jnp.maximum(x @ w1 + b1, 0.0)
    mu = h @ wmu + bmu
    std = jax.nn.softplus(h @ wstd + bstd)
    ns = mu + std * eps
    lp = -0.5 * ((ns - mu) / std) ** 2 - jnp.log(std) - 0.5 * math.log(2 * math.pi)
    act = jnp.tanh(ns)
    lp = lp - jnp.log(1.0 - jnp.tanh(act) ** 2 + 1e-7)
    act = act * action_bound

    assert action.shape == (batch, action_dim)
    assert log_prob.shape == (batch, action_dim)
    assert jnp.allclose(action, act, atol=1e-5, rtol=1e-5)
    assert jnp.allclose(log_prob, lp, atol=1e-5, rtol=1e-5)

    print("KERNEL_OK")
</pallas_src>

<mosaic_0001>
module attributes {stable_mosaic.version = 11 : i64} {
  func.func @policy_kernel(%arg0: i32, %arg1: memref<16x128xf32, #tpu.memory_space<vmem>>, %arg2: memref<32x16xf32, #tpu.memory_space<vmem>>, %arg3: memref<32x1xf32, #tpu.memory_space<vmem>>, %arg4: memref<16x32xf32, #tpu.memory_space<vmem>>, %arg5: memref<16x1xf32, #tpu.memory_space<vmem>>, %arg6: memref<8x128xf32, #tpu.memory_space<vmem>>, %arg7: memref<16x128xf32, #tpu.memory_space<vmem>>) attributes {dimension_semantics = [#tpu.dimension_semantics<parallel>], iteration_bounds = array<i64: 1>, scalar_prefetch = 0 : i64, scratch_operands = 0 : i64, tpu.core_type = #tpu.core_type<tc>, window_params = [{transform_indices = @transform_0, window_bounds = array<i64: 16, 128>}, {pipeline_mode = #tpu.pipeline_mode<synchronous>, transform_indices = @transform_1, window_bounds = array<i64: 32, 16>}, {pipeline_mode = #tpu.pipeline_mode<synchronous>, transform_indices = @transform_2, window_bounds = array<i64: 32, 1>}, {pipeline_mode = #tpu.pipeline_mode<synchronous>, transform_indices = @transform_3, window_bounds = array<i64: 16, 32>}, {pipeline_mode = #tpu.pipeline_mode<synchronous>, transform_indices = @transform_4, window_bounds = array<i64: 16, 1>}, {transform_indices = @transform_5, window_bounds = array<i64: 8, 128>}, {transform_indices = @transform_6, window_bounds = array<i64: 16, 128>}]} {
    %c0 = arith.constant 0 : index
    %c0_0 = arith.constant 0 : index
    %0 = vector.load %arg1[%c0, %c0_0] : memref<16x128xf32, #tpu.memory_space<vmem>>, vector<16x128xf32>
    %c0_1 = arith.constant 0 : index
    %c0_2 = arith.constant 0 : index
    %1 = vector.load %arg2[%c0_1, %c0_2] : memref<32x16xf32, #tpu.memory_space<vmem>>, vector<32x16xf32>
    %cst = arith.constant dense<0.000000e+00> : vector<32x128xf32>
    %2 = tpu.matmul %1, %0, %cst {dimension_numbers = #tpu.dot_dimension_numbers<[1], [0], [0], [1], [0, 0, 1, 1], [], []>} : vector<32x16xf32>, vector<16x128xf32>, vector<32x128xf32> -> vector<32x128xf32>
    %c0_3 = arith.constant 0 : index
    %c0_4 = arith.constant 0 : index
    %3 = vector.load %arg3[%c0_3, %c0_4] : memref<32x1xf32, #tpu.memory_space<vmem>>, vector<32x1xf32>
    %4 = vector.broadcast %3 : vector<32x1xf32> to vector<32x128xf32>
    %5 = arith.addf %2, %4 : vector<32x128xf32>
    %cst_5 = arith.constant 0.000000e+00 : f32
    %6 = vector.broadcast %cst_5 : f32 to vector<32x128xf32>
    %7 = arith.maximumf %5, %6 : vector<32x128xf32>
    %c0_6 = arith.constant 0 : index
    %c0_7 = arith.constant 0 : index
    %8 = vector.load %arg4[%c0_6, %c0_7] : memref<16x32xf32, #tpu.memory_space<vmem>>, vector<16x32xf32>
    %cst_8 = arith.constant dense<0.000000e+00> : vector<16x128xf32>
    %9 = tpu.matmul %8, %7, %cst_8 {dimension_numbers = #tpu.dot_dimension_numbers<[1], [0], [0], [1], [0, 0, 1, 1], [], []>} : vector<16x32xf32>, vector<32x128xf32>, vector<16x128xf32> -> vector<16x128xf32>
    %c0_9 = arith.constant 0 : index
    %c0_10 = arith.constant 0 : index
    %10 = vector.load %arg5[%c0_9, %c0_10] : memref<16x1xf32, #tpu.memory_space<vmem>>, vector<16x1xf32>
    %11 = vector.broadcast %10 : vector<16x1xf32> to vector<16x128xf32>
    %12 = arith.addf %9, %11 : vector<16x128xf32>
    %13 = vector.extract_strided_slice %12 {offsets = [0, 0], sizes = [8, 128], strides = [1, 1]} : vector<16x128xf32> to vector<8x128xf32>
    %14 = vector.extract_strided_slice %12 {offsets = [8, 0], sizes = [8, 128], strides = [1, 1]} : vector<16x128xf32> to vector<8x128xf32>
    %cst_11 = arith.constant 0.000000e+00 : f32
    %15 = vector.broadcast %cst_11 : f32 to vector<8x128xf32>
    %16 = arith.maximumf %14, %15 : vector<8x128xf32>
    %17 = math.absf %14 : vector<8x128xf32>
    %cst_12 = arith.constant 0.000000e+00 : f32
    %18 = vector.broadcast %cst_12 : f32 to vector<8x128xf32>
    %19 = arith.subf %18, %17 : vector<8x128xf32>
    %20 = math.exp %19 : vector<8x128xf32>
    %21 = math.log1p %20 : vector<8x128xf32>
    %22 = arith.addf %16, %21 : vector<8x128xf32>
    %c0_13 = arith.constant 0 : index
    %c0_14 = arith.constant 0 : index
    %23 = vector.load %arg6[%c0_13, %c0_14] : memref<8x128xf32, #tpu.memory_space<vmem>>, vector<8x128xf32>
    %24 = arith.mulf %22, %23 : vector<8x128xf32>
    %25 = arith.addf %13, %24 : vector<8x128xf32>
    %26 = math.tanh %25 : vector<8x128xf32>
    %27 = math.tanh %26 : vector<8x128xf32>
    %cst_15 = arith.constant -5.000000e-01 : f32
    %28 = vector.broadcast %cst_15 : f32 to vector<8x128xf32>
    %29 = arith.mulf %28, %23 : vector<8x128xf32>
    %30 = arith.mulf %29, %23 : vector<8x128xf32>
    %cst_16 = arith.constant 0.918938517 : f32
    %31 = vector.broadcast %cst_16 : f32 to vector<8x128xf32>
    %32 = arith.subf %30, %31 : vector<8x128xf32>
    %33 = arith.mulf %27, %27 : vector<8x128xf32>
    %cst_17 = arith.constant 1.000000e+00 : f32
    %34 = vector.broadcast %cst_17 : f32 to vector<8x128xf32>
    %35 = arith.subf %34, %33 : vector<8x128xf32>
    %cst_18 = arith.constant 1.000000e-07 : f32
    %36 = vector.broadcast %cst_18 : f32 to vector<8x128xf32>
    %37 = arith.addf %35, %36 : vector<8x128xf32>
    %38 = arith.mulf %22, %37 : vector<8x128xf32>
    %39 = math.log %38 : vector<8x128xf32>
    %40 = arith.subf %32, %39 : vector<8x128xf32>
    %cst_19 = arith.constant 2.000000e+00 : f32
    %41 = vector.broadcast %cst_19 : f32 to vector<8x128xf32>
    %42 = arith.mulf %26, %41 : vector<8x128xf32>
    %c0_20 = arith.constant 0 : index
    %c0_21 = arith.constant 0 : index
    %43 = vector.load %arg7[%c0_20, %c0_21] : memref<16x128xf32, #tpu.memory_space<vmem>>, vector<8x128xf32>
    tpu.vector_store %arg7[%c0_20, %c0_21], %42 {strides = array<i32>} : memref<16x128xf32, #tpu.memory_space<vmem>>, vector<8x128xf32>,
    %c8 = arith.constant 8 : index
    %c0_22 = arith.constant 0 : index
    %44 = vector.load %arg7[%c8, %c0_22] : memref<16x128xf32, #tpu.memory_space<vmem>>, vector<8x128xf32>
    tpu.vector_store %arg7[%c8, %c0_22], %40 {strides = array<i32>} : memref<16x128xf32, #tpu.memory_space<vmem>>, vector<8x128xf32>,
    return
  }
  func.func @transform_0(%arg0: i32) -> (i32, i32) {
    %c0_i32 = arith.constant 0 : i32
    %c0_i32_0 = arith.constant 0 : i32
    return %c0_i32, %arg0 : i32, i32
  }
  func.func @transform_1(%arg0: i32) -> (i32, i32) {
    %c0_i32 = arith.constant 0 : i32
    %c0_i32_0 = arith.constant 0 : i32
    %c0_i32_1 = arith.constant 0 : i32
    return %c0_i32, %c0_i32_0 : i32, i32
  }
  func.func @transform_2(%arg0: i32) -> (i32, i32) {
    %c0_i32 = arith.constant 0 : i32
    %c0_i32_0 = arith.constant 0 : i32
    %c0_i32_1 = arith.constant 0 : i32
    return %c0_i32, %c0_i32_0 : i32, i32
  }
  func.func @transform_3(%arg0: i32) -> (i32, i32) {
    %c0_i32 = arith.constant 0 : i32
    %c0_i32_0 = arith.constant 0 : i32
    %c0_i32_1 = arith.constant 0 : i32
    return %c0_i32, %c0_i32_0 : i32, i32
  }
  func.func @transform_4(%arg0: i32) -> (i32, i32) {
    %c0_i32 = arith.constant 0 : i32
    %c0_i32_0 = arith.constant 0 : i32
    %c0_i32_1 = arith.constant 0 : i32
    return %c0_i32, %c0_i32_0 : i32, i32
  }
  func.func @transform_5(%arg0: i32) -> (i32, i32) {
    %c0_i32 = arith.constant 0 : i32
    %c0_i32_0 = arith.constant 0 : i32
    return %c0_i32, %arg0 : i32, i32
  }
  func.func @transform_6(%arg0: i32) -> (i32, i32) {
    %c0_i32 = arith.constant 0 : i32
    %c0_i32_0 = arith.constant 0 : i32
    return %c0_i32, %arg0 : i32, i32
  }
}

</mosaic_0001>

<bundles_post_ra>
// kernel: tpu_custom_call.1
= control target key start
LH: loop header
LB: loop body
LE: loop exit
PB: predicated region body
PF: predicated region fallthrough
CT: control target
= control target key end

     0   :  { %vm54_vm0 = vcmask 130048   ;;  %v393_v4 = vmov 0   ;;  %s495_s0 = inlined_call_operand.vmem [shape: f32[16,128], index: 0, kind: input, shape index: {}]   ;;  %s496_s1 = inlined_call_operand.vmem [shape: f32[32,16], index: 1, kind: input, shape index: {}]   ;;  %s497_s2 = inlined_call_operand.vmem [shape: f32[32,1], index: 2, kind: input, shape index: {}]   ;;  %s498_s3 = inlined_call_operand.vmem [shape: f32[16,32], index: 3, kind: input, shape index: {}]   ;;  %s499_s4 = inlined_call_operand.vmem [shape: f32[16,1], index: 4, kind: input, shape index: {}]   ;;  %s500_s5 = inlined_call_operand.vmem [shape: f32[8,128], index: 5, kind: input, shape index: {}]   ;;  %s501_s6 = inlined_call_operand.hbm [shape: f32[16,128], index: 6, kind: output, shape index: {}]  }
   0x1   :  { %v24_v0 = vld [vmem:[%s495_s0] sm:$0xff]  ;;  %v25_v1 = vld [vmem:[%s495_s0 + $0x8] sm:$0xff]  ;;  %357 = vset.pattern.permute.xlu0 %v393_v4  ;;  %358 = vset.pattern.permute.xlu1 %v393_v4  ;;  %v32_v6 = vld [vmem:[%s497_s2 + $0x10] sm:$0xff] }
   0x2   :  { %v26_v2 = vld [vmem:[%s496_s1] sm:$0xff]  ;;  %v341_v3 = vpack.c.bf16 %v25_v1, %v24_v0  ;;  %v27_v7 = vld [vmem:[%s496_s1 + $0x8] sm:$0xff]  ;;  %46 = vperm.xlu1 %358, %v32_v6  }
   0x3   :  { %324 = vmatprep.mubr.msk.f32.mxu0 %vm54_vm0, %v26_v2  ;;  %v30_v5 = vld [vmem:[%s497_s2] sm:$0xff]  ;;  %v31_v8 = vld [vmem:[%s497_s2 + $0x8] sm:$0xff] }
   0x4   :  { %342 = vmatprep.subr.bf16.mxu0 %v341_v3  ;;  %36 = vperm.xlu0 %357, %v30_v5  }
   0x5   :  { %344 = vmatpush3.bf16.msra.mxu0 %v341_v3 }
   0x6   :  { %11 = vsyncpa [#allocation3], 0  ;;  %v28_v9 = vld [vmem:[%s496_s1 + $0x10] sm:$0xff]  ;;  %v33_v10 = vld [vmem:[%s497_s2 + $0x18] sm:$0xff]  ;;  %vm170_vm1 = vcmask 261120  }
   0x7   :  { %v29_v11 = vld [vmem:[%s496_s1 + $0x18] sm:$0xff]  ;;  %51 = vperm.xlu1 %358, %v33_v10   ;;  %v159_v12 = vld [vmem:[%s499_s4 + $0x8] sm:$0xff]  ;;  %v158_v13 = vld [vmem:[%s499_s4] sm:$0xff] }
   0x8   :  { %325 = vmatmul.mubr.msk.f32.vlgmr.msra.gmra.mrb[0].mxu0 %vm54_vm0, %v27_v7  ;;  %41 = vperm.xlu0 %357, %v31_v8   ;;  %v156_v14 = vld [vmem:[%s498_s3] sm:$0xff]  ;;  %v157_v33 = vld [vmem:[%s498_s3 + $0x8] sm:$0xff] }
   0x9   :  { %327 = vmatprep.mubr.msk.f32.mxu0 %vm54_vm0, %v28_v9  ;;  %338 = vmatprep.mubr.msk.f32.mxu1 %vm170_vm1, %v156_v14  ;;  %v267_v51 = vld [vmem:[%s500_s5] sm:$0xff]  ;;  %s394_s5 = smov [#allocation2]  }
   0xa   :  { %v272_v0 = vmul.f32 -0.5, %v267_v51  ;;  %s290_s22 = sshll.u32 %s394_s5, 4  ;;  %s291_s22 = int_to_ptr.vmem [resolvable:$true] %s290_s22 }
   0xb   :  { %162 = vperm.xlu1 %358, %v158_v13   ;;  %s369_s23 = scalar_lea.vmem %s291_s22, 256  ;;  %p374_p1 = scmp.lt.s32.totalorder %s291_s22, %s291_s22 }
   0xc   :  { %328 = vmatmul.mubr.msk.f32.gmra.mrb[2].mxu0 %vm54_vm0, %v29_v11  ;;  %167 = vperm.xlu0 %357, %v159_v12   ;;  %v273_v1 = vmul.f32 %v272_v0, %v267_v51  ;;  %p370_p0 = scmp.ne.s32.totalorder %s291_s22, %s369_s23  ;;  %p375_p2 = scmp.lt.s32.totalorder %s369_s23, %s369_s23 }
   0xe   :  { %v307_v2 = vadd.f32 -0.9189385, %v273_v1  ;;  %p376_p3 = por %p375_p2, %p374_p1 }
  0x10   :  { %p377_p4 = pnand %p376_p3, %p370_p0 }
  0x81   :  { %v47_v16 = vpop.permute.xlu1 %46 }
  0x83   :  { %v37_v15 = vpop.permute.xlu0 %36 }
  0x86   :  { %v52_v23 = vpop.permute.xlu1 %51 }
  0x87   :  { %v42_v17 = vpop.permute.xlu0 %41 }
  0x8a   :  { %v163_v53 = vpop.permute.xlu1 %162 }
  0x8b   :  { %v168_v34 = vpop.permute.xlu0 %167 }
  0xdb   :  { %v326_v18 = vpop.f32.mrb[0].mxu0 }
  0xdc   :  { %v139_v19 = vadd.f32 %v326_v18, %v42_v17  ;;  %v133_v20 = vpop.f32.mrb[1].mxu0 }
  0xdd   :  { %v134_v21 = vadd.f32 %v133_v20, %v37_v15 }
  0xde   :  { %v153_v22 = vmax.f32 %v139_v19, 0.0 }
  0xdf   :  { %v152_v24 = vmax.f32 %v134_v21, 0.0  ;;  %v329_v25 = vpop.f32.mrb[2].mxu0 }
  0xe0   :  { %v149_v26 = vadd.f32 %v329_v25, %v52_v23  ;;  %v143_v27 = vpop.f32.mrb[3].mxu0 }
  0xe1   :  { %v144_v28 = vadd.f32 %v143_v27, %v47_v16  ;;  %v345_v29 = vpack.c.bf16 %v153_v22, %v152_v24 }
  0xe2   :  { %v155_v30 = vmax.f32 %v149_v26, 0.0 }
  0xe3   :  { %v154_v31 = vmax.f32 %v144_v28, 0.0  ;;  %346 = vmatprep.subr.bf16.mxu1 %v345_v29 }
  0xe4   :  { %348 = vmatpush3.bf16.msra.mxu1 %v345_v29 }
  0xe5   :  { %v349_v32 = vpack.c.bf16 %v155_v30, %v154_v31 }
  0xe7   :  { %350 = vmatprep.subr.bf16.mxu1 %v349_v32 }
  0xe8   :  { %352 = vmatpush3.bf16.msra.mxu1 %v349_v32 }
  0xeb   :  { %339 = vmatmul.mubr.msk.f32.vlgmr.msra.gmra.mrb[0].mxu1 %vm170_vm1, %v157_v33 }
 0x1be   :  { %v340_v35 = vpop.f32.mrb[0].mxu1 }
 0x1bf   :  { %v249_v36 = vadd.f32 %v340_v35, %v168_v34  ;;  %v243_v37 = vpop.f32.mrb[1].mxu1 }
 0x1c0   :  { %v244_v54 = vadd.f32 %v243_v37, %v163_v53 }
 0x1c1   :  { %v253_v38 = vand.u32 2147483647, %v249_v36  ;;  %v252_v49 = vmax.f32 %v249_v36, 0.0 }
 0x1c3   :  { %v254_v39 = vsub.f32 0.0, %v253_v38 }
 0x1c5   :  { %v255_v40 = vmul.f32 1.442695, %v254_v39 }
 0x1c7   :  { %359 = vpow2.f32 %v255_v40 }
 0x1d1   :  { %v360_v41 = vpop.eup %359 }
 0x1d2   :  { %v257_v42 = vadd.f32 1.0, %v360_v41  ;;  %v260_v43 = vmul.f32 -0.5, %v360_v41  ;;  %v263_v45 = vand.u32 2147483647, %v360_v41 }
 0x1d4   :  { %361 = vlog2.f32 %v257_v42  ;;  %v261_v44 = vadd.f32 1.0, %v260_v43  ;;  %vm264_vm2 = vcmp.lt.f32.partialorder %v263_v45, 0.0004427343 }
 0x1d6   :  { %v262_v48 = vmul.f32 %v360_v41, %v261_v44 }
 0x1de   :  { %v362_v46 = vpop.eup %361 }
 0x1df   :  { %v259_v47 = vmul.f32 0.6931472, %v362_v46 }
 0x1e1   :  { %v265_v50 = vsel %vm264_vm2, %v262_v48, %v259_v47 }
 0x1e2   :  { %v266_v52 = vadd.f32 %v265_v50, %v252_v49 }
 0x1e4   :  { %v268_v55 = vmul.f32 %v267_v51, %v266_v52 }
 0x1e6   :  { %v269_v56 = vadd.f32 %v268_v55, %v244_v54 }
 0x1e8   :  { %363 = vtanh.f32 %v269_v56 }
 0x1f2   :  { %v364_v57 = vpop.eup %363 }
 0x1f3   :  { %365 = vtanh.f32 %v364_v57  ;;  %v282_v58 = vmul.f32 2.0, %v364_v57 }
 0x1f5   :  { %283 = vst [vmem:[#allocation2] sm:$0xff] %v282_v58 }
 0x1fd   :  { %v366_v59 = vpop.eup %365 }
 0x1fe   :  { %v275_v60 = vmul.f32 %v366_v59, %v366_v59 }
 0x200   :  { %v276_v61 = vsub.f32 1.0, %v275_v60 }
 0x202   :  { %v277_v62 = vadd.f32 1e-07, %v276_v61 }
 0x204   :  { %v278_v63 = vmul.f32 %v277_v62, %v266_v52 }
 0x206   :  { %367 = vlog2.f32 %v278_v63 }
 0x210   :  { %v368_v3 = vpop.eup %367 }
 0x211   :  { %v280_v4 = vmul.f32 0.6931472, %v368_v3 }
 0x213   :  { %v281_v5 = vsub.f32 %v307_v2, %v280_v4 }
 0x215   :  { %284 = vst [vmem:[#allocation2 + $0x8] sm:$0xff] %v281_v5 }
 0x216   :  { %380 = shalt.err (!%p377_p4)
}
 0x217   :  { %s381_s26 = scalar_lea.hbm %s501_s6, 256 }
 0x218   :  { %p382_p5 = scmp.ne.s32.totalorder %s501_s6, %s381_s26  ;;  %p385_p6 = scmp.lt.u32.totalorder %s381_s26, %s501_s6 }
 0x21a   :  { %p387_p7 = pnand %p385_p6, %p382_p5 }
 0x21c   :  { %390 = shalt.err (!%p387_p7)
}
 0x21d   :  { %s395_s0 = smov 128   ;;  %s396_s7 = smov 8  }
 0x21e   :  { %296 = dma.vmem_to_hbm [thread:$0]  %s291_s22, 256, %s501_s6, [#allocation3], %s395_s0, %s395_s0, %s396_s7  }
 0x21f   :  { %391 = dma.done.wait [#allocation3], 256  }
 0x220   :  { %392 = vsyncadd [#allocation3], 4294967040 }
 0x221   :  { %300 = vsyncpa [#allocation3], 1 }

</bundles_post_ra>
